<compile_context>
chip_gen: v6e
topology: v6e:2x2x1
jax: 0.10.0
libtpu: 0.0.40
codegen_flags: <defaults>
</compile_context>

<pallas_src>
import jax
import jax.numpy as jnp
import numpy as np
from jax.experimental import pallas as pl
from jax.experimental.pallas import tpu as pltpu

# ---------------- configuration (small, TPU-tile friendly) ----------------
BS = 8                          # batch size
T = 4                           # frames (tokens) per modality
HIDDEN = 128                    # hidden_size
SAME_DIM = 128                  # same_dim (== hidden_size -> no video_dim_reduce_out)
EXPERT_DIMS = {                 # expert_dims: per-modality feature dim + token_type idx
    "motion": {"dim": 256, "idx": 1},
    "audio":  {"dim": 128, "idx": 2},
    "rgb":    {"dim": 256, "idx": 3},
}
MODALITIES = list(EXPERT_DIMS.keys())
M = len(MODALITIES)
DMAX = 256                      # expert dims zero-padded to a common lane-aligned width
NROW = (T + 1) * BS             # per modality: T*BS frame rows (frame-major) + BS agg rows = 40
L2_EPS = 1e-12                  # F.normalize default eps


# ------------------------------ fused kernel --------------------------------
# Single invocation (no grid). Per modality (static loop):
#   get_maxp  (pre-broadcast additive -inf mask -> one add, T-1 maximums, all-pad -> 0)
#   one (NROW, DMAX) @ (DMAX, HIDDEN) MXU matmul for frame rows + pooled row
#   F.normalize(dim=-1)  -> tokens output (dense (40,128) store)
#   identity vid_bert stand-in -> final F.normalize of the agg token
# Experts are written once as a lane-dense (BS, M*HIDDEN) store.
def mmtvid_kernel(feats_ref, addend_ref, anyvalid_ref, w_ref, b_ref,
                  tokens_ref, experts_ref):
    agg_blocks = []
    for m in range(M):                                   # static loop, M = 3
        x = feats_ref[m]                                 # (T*BS, DMAX) frame-major rows
        w = w_ref[m]                                     # (DMAX, HIDDEN)
        b = b_ref[m]                                     # (1, HIDDEN)

        # get_maxp: additive -inf/0 mask was pre-broadcast offline -> one VPU add;
        # max over the T tile-aligned frame slices; rows with no valid frame -> 0.
        masked = x + addend_ref[m]                       # (T*BS, DMAX)
        maxp = masked[0:BS, :]
        for t in range(1, T):
            maxp = jnp.maximum(maxp, masked[t * BS:(t + 1) * BS, :])
        maxp = jnp.where(anyvalid_ref[m] > 0.0, maxp, 0.0)          # (BS, DMAX)

        # one fused MXU matmul for all frame rows + the pooled row of every batch element
        lhs = jnp.concatenate([x, maxp], axis=0)                    # (NROW, DMAX)
        y = jnp.dot(lhs, w, preferred_element_type=jnp.float32) + b # (NROW, HIDDEN)
        # F.normalize(dim=-1): x / max(||x||, eps) == x * rsqrt(max(||x||^2, eps^2))
        ss = jnp.sum(y * y, axis=-1, keepdims=True)
        y = y * jax.lax.rsqrt(jnp.maximum(ss, L2_EPS * L2_EPS))
        tokens_ref[m] = y                                           # dense (40,128) store

        # TODO(synk): identity vid_bert stand-in -> encoder agg token == pooled row above.
        agg = y[T * BS:, :]                                         # (BS, HIDDEN)
        ss2 = jnp.sum(agg * agg, axis=-1, keepdims=True)            # final F.normalize
        agg_blocks.append(agg * jax.lax.rsqrt(jnp.maximum(ss2, L2_EPS * L2_EPS)))

    experts_ref[...] = jnp.concatenate(agg_blocks, axis=-1)         # one (8, 384) store


# ------------------------------ wrapper --------------------------------------
def mmtvid_forward(feats_fm, addend_fm, anyvalid, w_pad, b):
    """feats_fm:  (M, T*BS, DMAX) zero-padded, frame-major (row = t*BS + b) features.
       addend_fm: (M, T*BS, DMAX) additive get_maxp mask (0.0 valid / -inf pad).
       anyvalid:  (M, BS, 1) 1.0 if the batch element has any valid frame else 0.0.
       w_pad, b:  stacked ReduceDim weights (M, DMAX, HIDDEN) / (M, 1, HIDDEN).
       Returns (tokens (M, (T+1)*BS, HIDDEN), experts (BS, M*SAME_DIM))."""
    vmem = pl.BlockSpec(memory_space=pltpu.MemorySpace.VMEM)
    return pl.pallas_call(
        mmtvid_kernel,
        out_shape=(jax.ShapeDtypeStruct((M, NROW, HIDDEN), jnp.float32),
                   jax.ShapeDtypeStruct((BS, M * SAME_DIM), jnp.float32)),
        in_specs=[vmem] * 5,
        out_specs=(vmem, vmem),
    )(feats_fm, addend_fm, anyvalid, w_pad, b)


# ------------------------- offline input preparation -------------------------
def prepare_inputs(feats_list, ind, w_list, b_list):
    """Pure layout plumbing (no model compute hoisted):
       zero-pad expert dims to DMAX, transpose frames to frame-major rows so every kernel
       slice / store is a full (8,128) tile, pre-broadcast the additive -inf get_maxp mask,
       and stack the per-modality ReduceDim weights."""
    feats_fm, addend_fm, w_pad, b_pad = [], [], [], []
    for m, mod in enumerate(MODALITIES):
        d = EXPERT_DIMS[mod]["dim"]
        f = jnp.pad(feats_list[m], ((0, 0), (0, 0), (0, DMAX - d)))        # (BS, T, DMAX)
        feats_fm.append(jnp.transpose(f, (1, 0, 2)).reshape(T * BS, DMAX))
        add = jnp.where(ind[m] == 0.0, -jnp.inf, 0.0)                      # (BS, T)
        add = jnp.broadcast_to(jnp.transpose(add)[:, :, None], (T, BS, DMAX))
        addend_fm.append(add.reshape(T * BS, DMAX))
        w_pad.append(jnp.pad(w_list[m], ((0, DMAX - d), (0, 0))))
        b_pad.append(b_list[m][None, :])
    anyvalid = jnp.max(ind, axis=2)[..., None]                             # (M, BS, 1)
    return (jnp.stack(feats_fm), jnp.stack(addend_fm), anyvalid,
            jnp.stack(w_pad), jnp.stack(b_pad))


# --------------------------- pure-JAX reference -------------------------------
def mmtvid_reference(feats_list, ind, w_list, b_list):
    tokens, experts = [], []
    for m in range(M):
        x, mask = feats_list[m], ind[m]
        w, bb = w_list[m], b_list[m]
        # per-frame ReduceDim
        red = jnp.einsum("btd,dh->bth", x, w) + bb
        red = red / jnp.maximum(jnp.linalg.norm(red, axis=-1, keepdims=True), L2_EPS)
        # get_maxp + ReduceDim
        addend = jnp.where(mask == 0.0, -jnp.inf, 0.0)
        maxp = jnp.max(x + addend[..., None], axis=1)
        maxp = jnp.where(jnp.all(mask == 0.0, axis=1)[:, None], 0.0, maxp)
        agg = maxp @ w + bb
        agg = agg / jnp.maximum(jnp.linalg.norm(agg, axis=-1, keepdims=True), L2_EPS)
        tokens.append(jnp.concatenate(
            [jnp.transpose(red, (1, 0, 2)).reshape(T * BS, HIDDEN), agg], axis=0))
        emb = agg                                       # identity vid_bert stand-in
        experts.append(emb / jnp.maximum(jnp.linalg.norm(emb, axis=-1, keepdims=True), L2_EPS))
    return jnp.stack(tokens), jnp.concatenate(experts, axis=1)


# ------------------------------ input builder ---------------------------------
def make_inputs(key):
    ks = jax.random.split(key, 2 * M + 2)
    feats_list, w_list, b_list = [], [], []
    for m, mod in enumerate(MODALITIES):
        d = EXPERT_DIMS[mod]["dim"]
        feats_list.append(jax.random.normal(ks[m], (BS, T, d), jnp.float32))
        w_list.append(0.05 * jax.random.normal(ks[M + m], (d, HIDDEN), jnp.float32))
        b_list.append(0.05 * jax.random.normal(jax.random.fold_in(ks[2 * M], m),
                                               (HIDDEN,), jnp.float32))
    ind = (jax.random.uniform(ks[2 * M + 1], (M, BS, T)) > 0.3).astype(jnp.float32)
    ind = ind.at[0, 0, :].set(0.0)            # exercise the all-pad branch of get_maxp
    return feats_list, ind, w_list, b_list


if __name__ == "__main__":
    feats_list, ind, w_list, b_list = make_inputs(jax.random.PRNGKey(0))
    kernel_inputs = prepare_inputs(feats_list, ind, w_list, b_list)

    tokens, experts = jax.block_until_ready(mmtvid_forward(*kernel_inputs))
    tokens_ref, experts_ref = jax.block_until_ready(
        mmtvid_reference(feats_list, ind, w_list, b_list))

    np.testing.assert_allclose(np.asarray(tokens), np.asarray(tokens_ref),
                               rtol=1e-3, atol=1e-3)
    np.testing.assert_allclose(np.asarray(experts), np.asarray(experts_ref),
                               rtol=1e-3, atol=1e-3)
    assert experts.shape == (BS, M * SAME_DIM)
    assert tokens.shape == (M, NROW, HIDDEN)
    print("KERNEL_OK")
</pallas_src>

<mosaic_0001>
module attributes {stable_mosaic.version = 11 : i64} {
  func.func @mmtvid_kernel(%arg0: memref<3x32x256xf32, #tpu.memory_space<vmem>>, %arg1: memref<3x32x256xf32, #tpu.memory_space<vmem>>, %arg2: memref<3x8x1xf32, #tpu.memory_space<vmem>>, %arg3: memref<3x256x128xf32, #tpu.memory_space<vmem>>, %arg4: memref<3x1x128xf32, #tpu.memory_space<vmem>>, %arg5: memref<3x40x128xf32, #tpu.memory_space<vmem>>, %arg6: memref<8x384xf32, #tpu.memory_space<vmem>>) attributes {dimension_semantics = [], scalar_prefetch = 0 : i64, scratch_operands = 0 : i64, tpu.core_type = #tpu.core_type<tc>} {
    %c0 = arith.constant 0 : index
    %c0_0 = arith.constant 0 : index
    %c0_1 = arith.constant 0 : index
    %0 = vector.load %arg0[%c0, %c0_0, %c0_1] : memref<3x32x256xf32, #tpu.memory_space<vmem>>, vector<1x32x256xf32>
    %1 = vector.shape_cast %0 : vector<1x32x256xf32> to vector<32x256xf32>
    %c0_2 = arith.constant 0 : index
    %c0_3 = arith.constant 0 : index
    %c0_4 = arith.constant 0 : index
    %2 = vector.load %arg3[%c0_2, %c0_3, %c0_4] : memref<3x256x128xf32, #tpu.memory_space<vmem>>, vector<1x256x128xf32>
    %3 = vector.shape_cast %2 : vector<1x256x128xf32> to vector<256x128xf32>
    %c0_5 = arith.constant 0 : index
    %c0_6 = arith.constant 0 : index
    %c0_7 = arith.constant 0 : index
    %4 = vector.load %arg4[%c0_5, %c0_6, %c0_7] : memref<3x1x128xf32, #tpu.memory_space<vmem>>, vector<1x1x128xf32>
    %5 = vector.shape_cast %4 : vector<1x1x128xf32> to vector<1x128xf32>
    %c0_8 = arith.constant 0 : index
    %c0_9 = arith.constant 0 : index
    %c0_10 = arith.constant 0 : index
    %6 = vector.load %arg1[%c0_8, %c0_9, %c0_10] : memref<3x32x256xf32, #tpu.memory_space<vmem>>, vector<1x32x256xf32>
    %7 = vector.shape_cast %6 : vector<1x32x256xf32> to vector<32x256xf32>
    %8 = arith.addf %1, %7 : vector<32x256xf32>
    %9 = vector.extract_strided_slice %8 {offsets = [0, 0], sizes = [8, 256], strides = [1, 1]} : vector<32x256xf32> to vector<8x256xf32>
    %10 = vector.extract_strided_slice %8 {offsets = [8, 0], sizes = [8, 256], strides = [1, 1]} : vector<32x256xf32> to vector<8x256xf32>
    %11 = arith.maximumf %9, %10 : vector<8x256xf32>
    %12 = vector.extract_strided_slice %8 {offsets = [16, 0], sizes = [8, 256], strides = [1, 1]} : vector<32x256xf32> to vector<8x256xf32>
    %13 = arith.maximumf %11, %12 : vector<8x256xf32>
    %14 = vector.extract_strided_slice %8 {offsets = [24, 0], sizes = [8, 256], strides = [1, 1]} : vector<32x256xf32> to vector<8x256xf32>
    %15 = arith.maximumf %13, %14 : vector<8x256xf32>
    %c0_11 = arith.constant 0 : index
    %c0_12 = arith.constant 0 : index
    %c0_13 = arith.constant 0 : index
    %16 = vector.load %arg2[%c0_11, %c0_12, %c0_13] : memref<3x8x1xf32, #tpu.memory_space<vmem>>, vector<1x8x1xf32>
    %17 = vector.shape_cast %16 : vector<1x8x1xf32> to vector<8x1xf32>
    %cst = arith.constant 0.000000e+00 : f32
    %18 = vector.broadcast %cst : f32 to vector<8x1xf32>
    %19 = arith.cmpf ogt, %17, %18 : vector<8x1xf32>
    %cst_14 = arith.constant 0.000000e+00 : f32
    %20 = vector.shape_cast %19 : vector<8x1xi1> to vector<8x1xi1>
    %21 = vector.broadcast %20 : vector<8x1xi1> to vector<8x256xi1>
    %22 = vector.broadcast %cst_14 : f32 to vector<8x256xf32>
    %23 = arith.select %21, %15, %22 : vector<8x256xi1>, vector<8x256xf32>
    %24 = tpu.concatenate %1, %23 in 0 : vector<32x256xf32>, vector<8x256xf32> -> vector<40x256xf32>
    %cst_15 = arith.constant dense<0.000000e+00> : vector<40x128xf32>
    %25 = tpu.matmul %24, %3, %cst_15 {dimension_numbers = #tpu.dot_dimension_numbers<[1], [0], [0], [1], [0, 0, 1, 1], [], []>} : vector<40x256xf32>, vector<256x128xf32>, vector<40x128xf32> -> vector<40x128xf32>
    %26 = vector.broadcast %5 : vector<1x128xf32> to vector<40x128xf32>
    %27 = arith.addf %25, %26 : vector<40x128xf32>
    %28 = arith.mulf %27, %27 : vector<40x128xf32>
    %cst_16 = arith.constant dense<0.000000e+00> : vector<40xf32>
    %29 = vector.multi_reduction <add>, %28, %cst_16 [1] : vector<40x128xf32> to vector<40xf32>
    %30 = vector.shape_cast %29 : vector<40xf32> to vector<40x1xf32>
    %cst_17 = arith.constant 1.000000e-24 : f32
    %31 = vector.broadcast %cst_17 : f32 to vector<40x1xf32>
    %32 = arith.maximumf %30, %31 : vector<40x1xf32>
    %33 = math.rsqrt %32 : vector<40x1xf32>
    %34 = vector.broadcast %33 : vector<40x1xf32> to vector<40x128xf32>
    %35 = arith.mulf %27, %34 : vector<40x128xf32>
    %c0_18 = arith.constant 0 : index
    %c0_19 = arith.constant 0 : index
    %c0_20 = arith.constant 0 : index
    %36 = vector.load %arg5[%c0_18, %c0_19, %c0_20] : memref<3x40x128xf32, #tpu.memory_space<vmem>>, vector<1x40x128xf32>
    %37 = vector.shape_cast %36 : vector<1x40x128xf32> to vector<40x128xf32>
    %38 = vector.shape_cast %35 : vector<40x128xf32> to vector<1x40x128xf32>
    tpu.vector_store %arg5[%c0_18, %c0_19, %c0_20], %38 {strides = array<i32>} : memref<3x40x128xf32, #tpu.memory_space<vmem>>, vector<1x40x128xf32>,
    %39 = vector.extract_strided_slice %35 {offsets = [32, 0], sizes = [8, 128], strides = [1, 1]} : vector<40x128xf32> to vector<8x128xf32>
    %40 = arith.mulf %39, %39 : vector<8x128xf32>
    %cst_21 = arith.constant dense<0.000000e+00> : vector<8xf32>
    %41 = vector.multi_reduction <add>, %40, %cst_21 [1] : vector<8x128xf32> to vector<8xf32>
    %42 = vector.shape_cast %41 : vector<8xf32> to vector<8x1xf32>
    %cst_22 = arith.constant 1.000000e-24 : f32
    %43 = vector.broadcast %cst_22 : f32 to vector<8x1xf32>
    %44 = arith.maximumf %42, %43 : vector<8x1xf32>
    %45 = math.rsqrt %44 : vector<8x1xf32>
    %46 = vector.broadcast %45 : vector<8x1xf32> to vector<8x128xf32>
    %47 = arith.mulf %39, %46 : vector<8x128xf32>
    %c1 = arith.constant 1 : index
    %c0_23 = arith.constant 0 : index
    %c0_24 = arith.constant 0 : index
    %48 = vector.load %arg0[%c1, %c0_23, %c0_24] : memref<3x32x256xf32, #tpu.memory_space<vmem>>, vector<1x32x256xf32>
    %49 = vector.shape_cast %48 : vector<1x32x256xf32> to vector<32x256xf32>
    %c1_25 = arith.constant 1 : index
    %c0_26 = arith.constant 0 : index
    %c0_27 = arith.constant 0 : index
    %50 = vector.load %arg3[%c1_25, %c0_26, %c0_27] : memref<3x256x128xf32, #tpu.memory_space<vmem>>, vector<1x256x128xf32>
    %51 = vector.shape_cast %50 : vector<1x256x128xf32> to vector<256x128xf32>
    %c1_28 = arith.constant 1 : index
    %c0_29 = arith.constant 0 : index
    %c0_30 = arith.constant 0 : index
    %52 = vector.load %arg4[%c1_28, %c0_29, %c0_30] : memref<3x1x128xf32, #tpu.memory_space<vmem>>, vector<1x1x128xf32>
    %53 = vector.shape_cast %52 : vector<1x1x128xf32> to vector<1x128xf32>
    %c1_31 = arith.constant 1 : index
    %c0_32 = arith.constant 0 : index
    %c0_33 = arith.constant 0 : index
    %54 = vector.load %arg1[%c1_31, %c0_32, %c0_33] : memref<3x32x256xf32, #tpu.memory_space<vmem>>, vector<1x32x256xf32>
    %55 = vector.shape_cast %54 : vector<1x32x256xf32> to vector<32x256xf32>
    %56 = arith.addf %49, %55 : vector<32x256xf32>
    %57 = vector.extract_strided_slice %56 {offsets = [0, 0], sizes = [8, 256], strides = [1, 1]} : vector<32x256xf32> to vector<8x256xf32>
    %58 = vector.extract_strided_slice %56 {offsets = [8, 0], sizes = [8, 256], strides = [1, 1]} : vector<32x256xf32> to vector<8x256xf32>
    %59 = arith.maximumf %57, %58 : vector<8x256xf32>
    %60 = vector.extract_strided_slice %56 {offsets = [16, 0], sizes = [8, 256], strides = [1, 1]} : vector<32x256xf32> to vector<8x256xf32>
    %61 = arith.maximumf %59, %60 : vector<8x256xf32>
    %62 = vector.extract_strided_slice %56 {offsets = [24, 0], sizes = [8, 256], strides = [1, 1]} : vector<32x256xf32> to vector<8x256xf32>
    %63 = arith.maximumf %61, %62 : vector<8x256xf32>
    %c1_34 = arith.constant 1 : index
    %c0_35 = arith.constant 0 : index
    %c0_36 = arith.constant 0 : index
    %64 = vector.load %arg2[%c1_34, %c0_35, %c0_36] : memref<3x8x1xf32, #tpu.memory_space<vmem>>, vector<1x8x1xf32>
    %65 = vector.shape_cast %64 : vector<1x8x1xf32> to vector<8x1xf32>
    %cst_37 = arith.constant 0.000000e+00 : f32
    %66 = vector.broadcast %cst_37 : f32 to vector<8x1xf32>
    %67 = arith.cmpf ogt, %65, %66 : vector<8x1xf32>
    %cst_38 = arith.constant 0.000000e+00 : f32
    %68 = vector.shape_cast %67 : vector<8x1xi1> to vector<8x1xi1>
    %69 = vector.broadcast %68 : vector<8x1xi1> to vector<8x256xi1>
    %70 = vector.broadcast %cst_38 : f32 to vector<8x256xf32>
    %71 = arith.select %69, %63, %70 : vector<8x256xi1>, vector<8x256xf32>
    %72 = tpu.concatenate %49, %71 in 0 : vector<32x256xf32>, vector<8x256xf32> -> vector<40x256xf32>
    %cst_39 = arith.constant dense<0.000000e+00> : vector<40x128xf32>
    %73 = tpu.matmul %72, %51, %cst_39 {dimension_numbers = #tpu.dot_dimension_numbers<[1], [0], [0], [1], [0, 0, 1, 1], [], []>} : vector<40x256xf32>, vector<256x128xf32>, vector<40x128xf32> -> vector<40x128xf32>
    %74 = vector.broadcast %53 : vector<1x128xf32> to vector<40x128xf32>
    %75 = arith.addf %73, %74 : vector<40x128xf32>
    %76 = arith.mulf %75, %75 : vector<40x128xf32>
    %cst_40 = arith.constant dense<0.000000e+00> : vector<40xf32>
    %77 = vector.multi_reduction <add>, %76, %cst_40 [1] : vector<40x128xf32> to vector<40xf32>
    %78 = vector.shape_cast %77 : vector<40xf32> to vector<40x1xf32>
    %cst_41 = arith.constant 1.000000e-24 : f32
    %79 = vector.broadcast %cst_41 : f32 to vector<40x1xf32>
    %80 = arith.maximumf %78, %79 : vector<40x1xf32>
    %81 = math.rsqrt %80 : vector<40x1xf32>
    %82 = vector.broadcast %81 : vector<40x1xf32> to vector<40x128xf32>
    %83 = arith.mulf %75, %82 : vector<40x128xf32>
    %c1_42 = arith.constant 1 : index
    %c0_43 = arith.constant 0 : index
    %c0_44 = arith.constant 0 : index
    %84 = vector.load %arg5[%c1_42, %c0_43, %c0_44] : memref<3x40x128xf32, #tpu.memory_space<vmem>>, vector<1x40x128xf32>
    %85 = vector.shape_cast %84 : vector<1x40x128xf32> to vector<40x128xf32>
    %86 = vector.shape_cast %83 : vector<40x128xf32> to vector<1x40x128xf32>
    tpu.vector_store %arg5[%c1_42, %c0_43, %c0_44], %86 {strides = array<i32>} : memref<3x40x128xf32, #tpu.memory_space<vmem>>, vector<1x40x128xf32>,
    %87 = vector.extract_strided_slice %83 {offsets = [32, 0], sizes = [8, 128], strides = [1, 1]} : vector<40x128xf32> to vector<8x128xf32>
    %88 = arith.mulf %87, %87 : vector<8x128xf32>
    %cst_45 = arith.constant dense<0.000000e+00> : vector<8xf32>
    %89 = vector.multi_reduction <add>, %88, %cst_45 [1] : vector<8x128xf32> to vector<8xf32>
    %90 = vector.shape_cast %89 : vector<8xf32> to vector<8x1xf32>
    %cst_46 = arith.constant 1.000000e-24 : f32
    %91 = vector.broadcast %cst_46 : f32 to vector<8x1xf32>
    %92 = arith.maximumf %90, %91 : vector<8x1xf32>
    %93 = math.rsqrt %92 : vector<8x1xf32>
    %94 = vector.broadcast %93 : vector<8x1xf32> to vector<8x128xf32>
    %95 = arith.mulf %87, %94 : vector<8x128xf32>
    %c2 = arith.constant 2 : index
    %c0_47 = arith.constant 0 : index
    %c0_48 = arith.constant 0 : index
    %96 = vector.load %arg0[%c2, %c0_47, %c0_48] : memref<3x32x256xf32, #tpu.memory_space<vmem>>, vector<1x32x256xf32>
    %97 = vector.shape_cast %96 : vector<1x32x256xf32> to vector<32x256xf32>
    %c2_49 = arith.constant 2 : index
    %c0_50 = arith.constant 0 : index
    %c0_51 = arith.constant 0 : index
    %98 = vector.load %arg3[%c2_49, %c0_50, %c0_51] : memref<3x256x128xf32, #tpu.memory_space<vmem>>, vector<1x256x128xf32>
    %99 = vector.shape_cast %98 : vector<1x256x128xf32> to vector<256x128xf32>
    %c2_52 = arith.constant 2 : index
    %c0_53 = arith.constant 0 : index
    %c0_54 = arith.constant 0 : index
    %100 = vector.load %arg4[%c2_52, %c0_53, %c0_54] : memref<3x1x128xf32, #tpu.memory_space<vmem>>, vector<1x1x128xf32>
    %101 = vector.shape_cast %100 : vector<1x1x128xf32> to vector<1x128xf32>
    %c2_55 = arith.constant 2 : index
    %c0_56 = arith.constant 0 : index
    %c0_57 = arith.constant 0 : index
    %102 = vector.load %arg1[%c2_55, %c0_56, %c0_57] : memref<3x32x256xf32, #tpu.memory_space<vmem>>, vector<1x32x256xf32>
    %103 = vector.shape_cast %102 : vector<1x32x256xf32> to vector<32x256xf32>
    %104 = arith.addf %97, %103 : vector<32x256xf32>
    %105 = vector.extract_strided_slice %104 {offsets = [0, 0], sizes = [8, 256], strides = [1, 1]} : vector<32x256xf32> to vector<8x256xf32>
    %106 = vector.extract_strided_slice %104 {offsets = [8, 0], sizes = [8, 256], strides = [1, 1]} : vector<32x256xf32> to vector<8x256xf32>
    %107 = arith.maximumf %105, %106 : vector<8x256xf32>
    %108 = vector.extract_strided_slice %104 {offsets = [16, 0], sizes = [8, 256], strides = [1, 1]} : vector<32x256xf32> to vector<8x256xf32>
    %109 = arith.maximumf %107, %108 : vector<8x256xf32>
    %110 = vector.extract_strided_slice %104 {offsets = [24, 0], sizes = [8, 256], strides = [1, 1]} : vector<32x256xf32> to vector<8x256xf32>
    %111 = arith.maximumf %109, %110 : vector<8x256xf32>
    %c2_58 = arith.constant 2 : index
    %c0_59 = arith.constant 0 : index
    %c0_60 = arith.constant 0 : index
    %112 = vector.load %arg2[%c2_58, %c0_59, %c0_60] : memref<3x8x1xf32, #tpu.memory_space<vmem>>, vector<1x8x1xf32>
    %113 = vector.shape_cast %112 : vector<1x8x1xf32> to vector<8x1xf32>
    %cst_61 = arith.constant 0.000000e+00 : f32
    %114 = vector.broadcast %cst_61 : f32 to vector<8x1xf32>
    %115 = arith.cmpf ogt, %113, %114 : vector<8x1xf32>
    %cst_62 = arith.constant 0.000000e+00 : f32
    %116 = vector.shape_cast %115 : vector<8x1xi1> to vector<8x1xi1>
    %117 = vector.broadcast %116 : vector<8x1xi1> to vector<8x256xi1>
    %118 = vector.broadcast %cst_62 : f32 to vector<8x256xf32>
    %119 = arith.select %117, %111, %118 : vector<8x256xi1>, vector<8x256xf32>
    %120 = tpu.concatenate %97, %119 in 0 : vector<32x256xf32>, vector<8x256xf32> -> vector<40x256xf32>
    %cst_63 = arith.constant dense<0.000000e+00> : vector<40x128xf32>
    %121 = tpu.matmul %120, %99, %cst_63 {dimension_numbers = #tpu.dot_dimension_numbers<[1], [0], [0], [1], [0, 0, 1, 1], [], []>} : vector<40x256xf32>, vector<256x128xf32>, vector<40x128xf32> -> vector<40x128xf32>
    %122 = vector.broadcast %101 : vector<1x128xf32> to vector<40x128xf32>
    %123 = arith.addf %121, %122 : vector<40x128xf32>
    %124 = arith.mulf %123, %123 : vector<40x128xf32>
    %cst_64 = arith.constant dense<0.000000e+00> : vector<40xf32>
    %125 = vector.multi_reduction <add>, %124, %cst_64 [1] : vector<40x128xf32> to vector<40xf32>
    %126 = vector.shape_cast %125 : vector<40xf32> to vector<40x1xf32>
    %cst_65 = arith.constant 1.000000e-24 : f32
    %127 = vector.broadcast %cst_65 : f32 to vector<40x1xf32>
    %128 = arith.maximumf %126, %127 : vector<40x1xf32>
    %129 = math.rsqrt %128 : vector<40x1xf32>
    %130 = vector.broadcast %129 : vector<40x1xf32> to vector<40x128xf32>
    %131 = arith.mulf %123, %130 : vector<40x128xf32>
    %c2_66 = arith.constant 2 : index
    %c0_67 = arith.constant 0 : index
    %c0_68 = arith.constant 0 : index
    %132 = vector.load %arg5[%c2_66, %c0_67, %c0_68] : memref<3x40x128xf32, #tpu.memory_space<vmem>>, vector<1x40x128xf32>
    %133 = vector.shape_cast %132 : vector<1x40x128xf32> to vector<40x128xf32>
    %134 = vector.shape_cast %131 : vector<40x128xf32> to vector<1x40x128xf32>
    tpu.vector_store %arg5[%c2_66, %c0_67, %c0_68], %134 {strides = array<i32>} : memref<3x40x128xf32, #tpu.memory_space<vmem>>, vector<1x40x128xf32>,
    %135 = vector.extract_strided_slice %131 {offsets = [32, 0], sizes = [8, 128], strides = [1, 1]} : vector<40x128xf32> to vector<8x128xf32>
    %136 = arith.mulf %135, %135 : vector<8x128xf32>
    %cst_69 = arith.constant dense<0.000000e+00> : vector<8xf32>
    %137 = vector.multi_reduction <add>, %136, %cst_69 [1] : vector<8x128xf32> to vector<8xf32>
    %138 = vector.shape_cast %137 : vector<8xf32> to vector<8x1xf32>
    %cst_70 = arith.constant 1.000000e-24 : f32
    %139 = vector.broadcast %cst_70 : f32 to vector<8x1xf32>
    %140 = arith.maximumf %138, %139 : vector<8x1xf32>
    %141 = math.rsqrt %140 : vector<8x1xf32>
    %142 = vector.broadcast %141 : vector<8x1xf32> to vector<8x128xf32>
    %143 = arith.mulf %135, %142 : vector<8x128xf32>
    %144 = tpu.concatenate %47, %95, %143 in 1 : vector<8x128xf32>, vector<8x128xf32>, vector<8x128xf32> -> vector<8x384xf32>
    %c0_71 = arith.constant 0 : index
    %c0_72 = arith.constant 0 : index
    %145 = vector.load %arg6[%c0_71, %c0_72] : memref<8x384xf32, #tpu.memory_space<vmem>>, vector<8x384xf32>
    tpu.vector_store %arg6[%c0_71, %c0_72], %144 {strides = array<i32>} : memref<8x384xf32, #tpu.memory_space<vmem>>, vector<8x384xf32>,
    return
  }
}

</mosaic_0001>

<bundles_post_ra>
// kernel: tpu_custom_call.1
= control target key start
LH: loop header
LB: loop body
LE: loop exit
PB: predicated region body
PF: predicated region fallthrough
CT: control target
= control target key end

     0   :  { %12 = vsyncpa [#allocation3], 0  ;;  %s1396_s0 = inlined_call_operand.hbm [shape: f32[3,32,256], index: 0, kind: input, shape index: {}]   ;;  %s1397_s1 = inlined_call_operand.hbm [shape: f32[3,32,256], index: 1, kind: input, shape index: {}]   ;;  %s1398_s2 = inlined_call_operand.vmem [shape: f32[3,8,1], index: 2, kind: input, shape index: {}]   ;;  %s1399_s3 = inlined_call_operand.hbm [shape: f32[3,256,128], index: 3, kind: input, shape index: {}]   ;;  %s1400_s4 = inlined_call_operand.vmem [shape: f32[3,1,128], index: 4, kind: input, shape index: {}]   ;;  %s1401_s5 = inlined_call_operand.hbm [shape: f32[3,40,128], index: 5, kind: output, shape index: {0}]   ;;  %s1402_s6 = inlined_call_operand.hbm [shape: f32[8,384], index: 6, kind: output, shape index: {1}]  }
   0x1   :  { %13 = vsyncpa [#allocation6], 0 }
   0x2   :  { %14 = vsyncpa [#allocation4], 0 }
   0x3   :  { %15 = vsyncpa [#allocation10], 0  ;;  %s1081_s21 = smov [#allocation5]   ;;  %s1082_s23 = smov [#allocation2]  }
   0x4   :  { %s33_s22 = sshll.u32 %s1081_s21, 4  ;;  %s21_s24 = sshll.u32 %s1082_s23, 4  ;;  %s34_s22 = int_to_ptr.vmem [resolvable:$true] %s33_s22  ;;  %s22_s24 = int_to_ptr.vmem [resolvable:$true] %s21_s24 }
   0x5   :  { %s981_s25 = scalar_lea.vmem %s34_s22, 3072  ;;  %p986_p1 = scmp.lt.s32.totalorder %s34_s22, %s34_s22 }
   0x6   :  { %p982_p0 = scmp.ne.s32.totalorder %s34_s22, %s981_s25  ;;  %p987_p2 = scmp.lt.s32.totalorder %s981_s25, %s981_s25 }
   0x8   :  { %p988_p3 = por %p987_p2, %p986_p1 }
   0xa   :  { %p989_p4 = pnand %p988_p3, %p982_p0 }
   0xc   :  { %992 = shalt.err (!%p989_p4)
}
   0xd   :  { %s1083_s26 = smov 256   ;;  %s1084_s27 = smov 16  }
   0xe   :  { %39 = dma.hbm_to_vmem [thread:$0]  %s1397_s1, 3072, %s34_s22, [#allocation6], %s1083_s26, %s1083_s26, %s1084_s27  }
   0xf   :  { %s1001_s30 = scalar_lea.vmem %s22_s24, 3072  ;;  %p1006_p6 = scmp.lt.s32.totalorder %s22_s24, %s22_s24 }
  0x10   :  { %p1002_p5 = scmp.ne.s32.totalorder %s22_s24, %s1001_s30  ;;  %p1007_p7 = scmp.lt.s32.totalorder %s1001_s30, %s1001_s30 }
  0x12   :  { %p1008_p8 = por %p1007_p7, %p1006_p6 }
  0x14   :  { %p1009_p9 = pnand %p1008_p8, %p1002_p5 }
  0x16   :  { %1012 = shalt.err (!%p1009_p9)
}
  0x17   :  { %27 = dma.hbm_to_vmem [thread:$0]  %s1396_s0, 3072, %s22_s24, [#allocation3], %s1083_s26, %s1083_s26, %s1084_s27  }
  0x18   :  { %s1085_s9 = smov [#allocation7]  }
  0x19   :  { %s47_s10 = sshll.u32 %s1085_s9, 4  ;;  %s48_s10 = int_to_ptr.vmem [resolvable:$true] %s47_s10 }
  0x1a   :  { %s1021_s11 = scalar_lea.vmem %s48_s10, 12288  ;;  %p1026_p11 = scmp.lt.s32.totalorder %s48_s10, %s48_s10 }
  0x1b   :  { %p1022_p10 = scmp.ne.s32.totalorder %s48_s10, %s1021_s11  ;;  %p1027_p12 = scmp.lt.s32.totalorder %s1021_s11, %s1021_s11 }
  0x1d   :  { %p1028_p13 = por %p1027_p12, %p1026_p11 }
  0x1f   :  { %p1029_p0 = pnand %p1028_p13, %p1022_p10 }
  0x21   :  { %1032 = shalt.err (!%p1029_p0)
}
  0x22   :  { %s1086_s1 = smov 128   ;;  %s1087_s12 = smov 8  }
  0x23   :  { %53 = dma.hbm_to_vmem [thread:$0]  %s1399_s3, 12288, %s48_s10, [#allocation6], %s1086_s1, %s1086_s1, %s1087_s12  }
  0x24   :  { %1073 = dma.done.wait [#allocation3], 3072  }
  0x25   :  { %1074 = vsyncadd [#allocation3], 4294964224 }
  0x26   :  { %1075 = dma.done.wait [#allocation6], 15360  }
  0x27   :  { %1076 = vsyncadd [#allocation6], 4294951936  ;;  %v1088_v0 = vmov 0   ;;  %v743_v1 = vld [vmem:[%s1398_s2 + $0x8] sm:$0xff]  ;;  %v128_v2 = vld [vmem:[%s1398_s2] sm:$0xff]  ;;  %s1090_s25 = smov [#allocation9]  }
  0x28   :  { %935 = vset.pattern.permute.xlu0 %v1088_v0  ;;  %936 = vset.pattern.permute.xlu1 %v1088_v0  ;;  %v748_v3 = vld [vmem:[%s1398_s2 + $0x10] sm:$0xff]  ;;  %vm343_vm0 = vcmp.gt.f32.partialorder %v743_v1, 0.0  ;;  %vm129_vm1 = vcmp.gt.f32.partialorder %v128_v2, 0.0  ;;  %v315_v4 = vld [vmem:[#allocation7 + $0x1f8] sm:$0xff]  ;;  %v313_v11 = vld [vmem:[#allocation7 + $0x1e8] sm:$0xff]  ;;  %s725_s26 = sshll.u32 %s1090_s25, 4  ;;  %s726_s26 = int_to_ptr.vmem [resolvable:$true] %s725_s26 }
  0x29   :  { %vm558_vm2 = vcmp.gt.f32.partialorder %v748_v3, 0.0  ;;  %v299_v5 = vld [vmem:[#allocation7 + $0x178] sm:$0xff]  ;;  %v344_v6 = vsel %vm343_vm0, 1, %v1088_v0  ;;  %799 = vmatprep.subr.mxu1 %v315_v4  ;;  %v314_v8 = vld [vmem:[#allocation7 + $0x1f0] sm:$0xff]  ;;  %v130_v10 = vsel %vm129_vm1, 1, %v1088_v0  ;;  %v297_v12 = vld [vmem:[#allocation7 + $0x168] sm:$0xff] }
  0x2a   :  { %v559_v7 = vsel %vm558_vm2, 1, %v1088_v0  ;;  %346 = vperm.xlu0 %935, %v344_v6   ;;  %v298_v9 = vld [vmem:[#allocation7 + $0x170] sm:$0xff]  ;;  %800 = vmatpush3.msra.mxu1 %v299_v5  ;;  %v312_v13 = vld [vmem:[#allocation7 + $0x1e0] sm:$0xff]  ;;  %v104_v14 = vld [vmem:[#allocation7 + $0xf8] sm:$0xff] }
  0x2b   :  { %561 = vperm.xlu1 %936, %v559_v7   ;;  %801 = vmatprep.subr.mxu1 %v314_v8  ;;  %v88_v15 = vld [vmem:[#allocation7 + $0x78] sm:$0xff]  ;;  %v296_v16 = vld [vmem:[#allocation7 + $0x160] sm:$0xff]  ;;  %v103_v17 = vld [vmem:[#allocation7 + $0xf0] sm:$0xff] }
  0x2c   :  { %802 = vmatpush3.msra.mxu1 %v298_v9  ;;  %v311_v18 = vld [vmem:[#allocation7 + $0x1d8] sm:$0xff]  ;;  %752 = vmatprep.subr.mxu0 %v104_v14  ;;  %v87_v19 = vld [vmem:[#allocation7 + $0x70] sm:$0xff]  ;;  %v102_v21 = vld [vmem:[#allocation7 + $0xe8] sm:$0xff] }
  0x2d   :  { %803 = vmatprep.subr.mxu1 %v313_v11  ;;  %v295_v20 = vld [vmem:[#allocation7 + $0x158] sm:$0xff]  ;;  %753 = vmatpush3.msra.mxu0 %v88_v15  ;;  %v310_v22 = vld [vmem:[#allocation7 + $0x1d0] sm:$0xff]  ;;  %v86_v23 = vld [vmem:[#allocation7 + $0x68] sm:$0xff] }
  0x2e   :  { %132 = vperm.xlu0 %935, %v130_v10   ;;  %804 = vmatpush3.msra.mxu1 %v297_v12  ;;  %v294_v24 = vld [vmem:[#allocation7 + $0x150] sm:$0xff]  ;;  %v101_v25 = vld [vmem:[#allocation7 + $0xe0] sm:$0xff]  ;;  %v309_v26 = vld [vmem:[#allocation7 + $0x1c8] sm:$0xff] }
  0x2f   :  { %805 = vmatprep.subr.mxu1 %v312_v13  ;;  %754 = vmatprep.subr.mxu0 %v103_v17  ;;  %v85_v27 = vld [vmem:[#allocation7 + $0x60] sm:$0xff]  ;;  %v293_v28 = vld [vmem:[#allocation7 + $0x148] sm:$0xff]  ;;  %v100_v29 = vld [vmem:[#allocation7 + $0xd8] sm:$0xff] }
  0x30   :  { %806 = vmatpush3.msra.mxu1 %v296_v16  ;;  %755 = vmatpush3.msra.mxu0 %v87_v19  ;;  %v308_v30 = vld [vmem:[#allocation7 + $0x1c0] sm:$0xff]  ;;  %v84_v31 = vld [vmem:[#allocation7 + $0x58] sm:$0xff]  ;;  %v99_v33 = vld [vmem:[#allocation7 + $0xd0] sm:$0xff] }
  0x31   :  { %807 = vmatprep.subr.mxu1 %v311_v18  ;;  %756 = vmatprep.subr.mxu0 %v102_v21  ;;  %v292_v32 = vld [vmem:[#allocation7 + $0x140] sm:$0xff]  ;;  %v307_v34 = vld [vmem:[#allocation7 + $0x1b8] sm:$0xff]  ;;  %v83_v35 = vld [vmem:[#allocation7 + $0x50] sm:$0xff] }
  0x32   :  { %808 = vmatpush3.msra.mxu1 %v295_v20  ;;  %757 = vmatpush3.msra.mxu0 %v86_v23  ;;  %v291_v36 = vld [vmem:[#allocation7 + $0x138] sm:$0xff]  ;;  %v98_v37 = vld [vmem:[#allocation7 + $0xc8] sm:$0xff]  ;;  %v306_v38 = vld [vmem:[#allocation7 + $0x1b0] sm:$0xff] }
  0x33   :  { %809 = vmatprep.subr.mxu1 %v310_v22  ;;  %758 = vmatprep.subr.mxu0 %v101_v25  ;;  %v82_v39 = vld [vmem:[#allocation7 + $0x48] sm:$0xff]  ;;  %v290_v40 = vld [vmem:[#allocation7 + $0x130] sm:$0xff]  ;;  %v97_v41 = vld [vmem:[#allocation7 + $0xc0] sm:$0xff] }
  0x34   :  { %810 = vmatpush3.msra.mxu1 %v294_v24  ;;  %759 = vmatpush3.msra.mxu0 %v85_v27  ;;  %v305_v42 = vld [vmem:[#allocation7 + $0x1a8] sm:$0xff]  ;;  %v81_v43 = vld [vmem:[#allocation7 + $0x40] sm:$0xff]  ;;  %v96_v45 = vld [vmem:[#allocation7 + $0xb8] sm:$0xff] }
  0x35   :  { %811 = vmatprep.subr.mxu1 %v309_v26  ;;  %760 = vmatprep.subr.mxu0 %v100_v29  ;;  %v289_v44 = vld [vmem:[#allocation7 + $0x128] sm:$0xff]  ;;  %v304_v46 = vld [vmem:[#allocation7 + $0x1a0] sm:$0xff]  ;;  %v303_v49 = vld [vmem:[#allocation7 + $0x198] sm:$0xff] }
  0x36   :  { %812 = vmatpush3.msra.mxu1 %v293_v28  ;;  %761 = vmatpush3.msra.mxu0 %v84_v31  ;;  %v276_v47 = vld [vmem:[#allocation2 + $0x48] sm:$0xff]  ;;  %v288_v48 = vld [vmem:[#allocation7 + $0x120] sm:$0xff]  ;;  %v80_v50 = vld [vmem:[#allocation7 + $0x38] sm:$0xff] }
  0x37   :  { %813 = vmatprep.subr.mxu1 %v308_v30  ;;  %762 = vmatprep.subr.mxu0 %v99_v33  ;;  %v287_v51 = vld [vmem:[#allocation7 + $0x118] sm:$0xff]  ;;  %v302_v52 = vld [vmem:[#allocation7 + $0x190] sm:$0xff]  ;;  %v320_v55 = vld [vmem:[#allocation5 + $0x48] sm:$0xff] }
  0x38   :  { %814 = vmatpush3.msra.mxu1 %v292_v32  ;;  %763 = vmatpush3.msra.mxu0 %v83_v35  ;;  %v95_v53 = vld [vmem:[#allocation7 + $0xb0] sm:$0xff]  ;;  %v301_v57 = vld [vmem:[#allocation7 + $0x188] sm:$0xff]  ;;  %v319_v58 = vld [vmem:[#allocation5 + $0x40] sm:$0xff]  ;;  %v1147_v1 = vadd.f32 %v320_v55, %v276_v47 }
  0x39   :  { %815 = vmatprep.subr.mxu1 %v307_v34  ;;  %764 = vmatprep.subr.mxu0 %v98_v37  ;;  %v286_v54 = vld [vmem:[#allocation7 + $0x110] sm:$0xff]  ;;  %v94_v59 = vld [vmem:[#allocation7 + $0xa8] sm:$0xff]  ;;  %v275_v61 = vld [vmem:[#allocation2 + $0x40] sm:$0xff] }
  0x3a   :  { %816 = vmatpush3.msra.mxu1 %v291_v36  ;;  %765 = vmatpush3.msra.mxu0 %v82_v39  ;;  %v79_v56 = vld [vmem:[#allocation7 + $0x30] sm:$0xff]  ;;  %v285_v60 = vld [vmem:[#allocation7 + $0x108] sm:$0xff]  ;;  %v93_v63 = vld [vmem:[#allocation7 + $0xa0] sm:$0xff]  ;;  %v1149_v6 = vadd.f32 %v319_v58, %v275_v61 }
  0x3b   :  { %817 = vmatprep.subr.mxu1 %v306_v38  ;;  %766 = vmatprep.subr.mxu0 %v97_v41  ;;  %v78_v62 = vld [vmem:[#allocation7 + $0x28] sm:$0xff]  ;;  %v300_v0 = vld [vmem:[#allocation7 + $0x180] sm:$0xff]  ;;  %v92_v3 = vld [vmem:[#allocation7 + $0x98] sm:$0xff] }
  0x3c   :  { %818 = vmatpush3.msra.mxu1 %v290_v40  ;;  %767 = vmatpush3.msra.mxu0 %v81_v43  ;;  %v77_v2 = vld [vmem:[#allocation7 + $0x20] sm:$0xff]  ;;  %v107_v4 = vld [vmem:[#allocation5 + $0x8] sm:$0xff]  ;;  %v1153_v8 = vld [vmem:[#allocation2 + $0x58] sm:$0xff] }
  0x3d   :  { %819 = vmatprep.subr.mxu1 %v305_v42  ;;  %768 = vmatprep.subr.mxu0 %v96_v45  ;;  %v284_v5 = vld [vmem:[#allocation7 + $0x100] sm:$0xff]  ;;  %v1151_v7 = vld [vmem:[#allocation2 + $0x8] sm:$0xff]  ;;  %v322_v9 = vld [vmem:[#allocation5 + $0x58] sm:$0xff] }
  0x3e   :  { %820 = vmatpush3.msra.mxu1 %v289_v44  ;;  %421 = vmatprep.mubr.f32.mxu1 %v276_v47  ;;  %v1155_v10 = vld [vmem:[#allocation7 + $0x2f8] sm:$0xff]  ;;  %v330_v11 = vadd.f32 %v322_v9, %v1153_v8  ;;  %v106_v12 = vld [vmem:[#allocation5] sm:$0xff]  ;;  %v1158_v13 = vld [vmem:[#allocation2 + $0x50] sm:$0xff]  ;;  %v115_v18 = vadd.f32 %v107_v4, %v1151_v7 }
  0x3f   :  { %821 = vmatprep.subr.mxu1 %v304_v46  ;;  %769 = vmatpush3.msra.mxu0 %v80_v50  ;;  %v321_v14 = vld [vmem:[#allocation5 + $0x50] sm:$0xff]  ;;  %v1160_v15 = vld [vmem:[#allocation7 + $0x278] sm:$0xff]  ;;  %v1167_v23 = vld [vmem:[#allocation2] sm:$0xff] }
  0x40   :  { %822 = vmatpush3.msra.mxu1 %v288_v48  ;;  %770 = vmatprep.subr.mxu0 %v95_v53  ;;  %v76_v16 = vld [vmem:[#allocation7 + $0x18] sm:$0xff]  ;;  %v91_v17 = vld [vmem:[#allocation7 + $0x90] sm:$0xff]  ;;  %v329_v19 = vadd.f32 %v321_v14, %v1158_v13  ;;  %v336_v22 = vmax.f32 %v1147_v1, %v330_v11  ;;  %v114_v27 = vadd.f32 %v106_v12, %v1167_v23  ;;  %v1176_v30 = vld [vmem:[#allocation2 + $0x68] sm:$0xff] }
  0x41   :  { %823 = vmatprep.subr.mxu1 %v303_v49  ;;  %771 = vmatpush3.msra.mxu0 %v79_v56  ;;  %v1164_v20 = vld [vmem:[#allocation7 + $0x2f0] sm:$0xff]  ;;  %v1169_v24 = vld [vmem:[#allocation2 + $0x18] sm:$0xff]  ;;  %v324_v31 = vld [vmem:[#allocation5 + $0x68] sm:$0xff] }
  0x42   :  { %824 = vmatpush3.msra.mxu1 %v287_v51  ;;  %772 = vmatprep.subr.mxu0 %v94_v59  ;;  %v75_v21 = vld [vmem:[#allocation7 + $0x10] sm:$0xff]  ;;  %v109_v25 = vld [vmem:[#allocation5 + $0x18] sm:$0xff]  ;;  %v335_v28 = vmax.f32 %v1149_v6, %v329_v19  ;;  %v1180_v33 = vld [vmem:[#allocation7 + $0x2e8] sm:$0xff]  ;;  %v332_v34 = vadd.f32 %v324_v31, %v1176_v30 }
  0x43   :  { %825 = vmatprep.subr.mxu1 %v302_v52  ;;  %773 = vmatpush3.msra.mxu0 %v78_v62  ;;  %v1171_v26 = vld [vmem:[#allocation7 + $0x270] sm:$0xff]  ;;  %v117_v29 = vadd.f32 %v109_v25, %v1169_v24  ;;  %v1183_v36 = vld [vmem:[#allocation2 + $0x60] sm:$0xff]  ;;  %v1186_v38 = vld [vmem:[#allocation7 + $0x268] sm:$0xff] }
  0x44   :  { %826 = vmatpush3.msra.mxu1 %v286_v54  ;;  %774 = vmatprep.subr.mxu0 %v93_v63  ;;  %v1178_v32 = vld [vmem:[#allocation2 + $0x10] sm:$0xff]  ;;  %v323_v37 = vld [vmem:[#allocation5 + $0x60] sm:$0xff]  ;;  %v90_v39 = vld [vmem:[#allocation7 + $0x88] sm:$0xff]  ;;  %v1193_v47 = vmax.f32 %v336_v22, %v332_v34 }
  0x45   :  { %827 = vmatprep.subr.mxu1 %v301_v57  ;;  %775 = vmatpush3.msra.mxu0 %v77_v2  ;;  %v108_v35 = vld [vmem:[#allocation5 + $0x10] sm:$0xff]  ;;  %v74_v40 = vld [vmem:[#allocation7 + $0x8] sm:$0xff]  ;;  %v89_v41 = vld [vmem:[#allocation7 + $0x80] sm:$0xff]  ;;  %v123_v42 = vmax.f32 %v115_v18, %v117_v29  ;;  %v331_v44 = vadd.f32 %v323_v37, %v1183_v36 }
  0x46   :  { %828 = vmatpush3.msra.mxu1 %v285_v60  ;;  %776 = vmatprep.subr.mxu0 %v92_v3  ;;  %v116_v43 = vadd.f32 %v108_v35, %v1178_v32  ;;  %v1191_v45 = vld [vmem:[#allocation7 + $0x2e0] sm:$0xff]  ;;  %v1195_v48 = vld [vmem:[#allocation2 + $0x28] sm:$0xff]  ;;  %v1201_v53 = vld [vmem:[#allocation2 + $0x78] sm:$0xff] }
  0x47   :  { %829 = vmatprep.subr.mxu1 %v300_v0  ;;  %777 = vmatpush3.msra.mxu0 %v76_v16  ;;  %v73_v46 = vld [vmem:[#allocation7] sm:$0xff]  ;;  %v111_v49 = vld [vmem:[#allocation5 + $0x28] sm:$0xff]  ;;  %v1198_v51 = vmax.f32 %v335_v28, %v331_v44  ;;  %v326_v54 = vld [vmem:[#allocation5 + $0x78] sm:$0xff] }
  0x48   :  { %830 = vmatpush3.msra.mxu1 %v284_v5  ;;  %778 = vmatprep.subr.mxu0 %v91_v17  ;;  %v122_v50 = vmax.f32 %v114_v27, %v116_v43  ;;  %v119_v52 = vadd.f32 %v111_v49, %v1195_v48  ;;  %v1203_v55 = vld [vmem:[#allocation2 + $0x20] sm:$0xff]  ;;  %v1207_v56 = vadd.f32 %v326_v54, %v1201_v53  ;;  %v1209_v58 = vld [vmem:[#allocation2 + $0x70] sm:$0xff]  ;;  %v1221_v0 = vld [vmem:[#allocation7 + $0x2d8] sm:$0xff] }
  0x49   :  { %422 = vmatmul.mubr.f32.vlgmr.msra.gmra.mxu1 %v275_v61  ;;  %893 = vmatprep.subr.mxu1 %v1155_v10  ;;  %v110_v57 = vld [vmem:[#allocation5 + $0x20] sm:$0xff]  ;;  %v325_v59 = vld [vmem:[#allocation5 + $0x70] sm:$0xff]  ;;  %v1225_v2 = vld [vmem:[#allocation2 + $0x38] sm:$0xff] }
  0x4a   :  { %909 = vmatpush3.msra.mxu1 %v1160_v15  ;;  %779 = vmatpush3.msra.mxu0 %v75_v21  ;;  %v1212_v60 = vld [vmem:[#allocation7 + $0x260] sm:$0xff]  ;;  %v1214_v61 = vmax.f32 %v123_v42, %v119_v52  ;;  %v118_v62 = vadd.f32 %v110_v57, %v1203_v55  ;;  %v1218_v63 = vadd.f32 %v325_v59, %v1209_v58  ;;  %v113_v3 = vld [vmem:[#allocation5 + $0x38] sm:$0xff]  ;;  %v1237_v11 = vld [vmem:[#allocation2 + $0x30] sm:$0xff] }
  0x4b   :  { %894 = vmatprep.subr.mxu1 %v1164_v20  ;;  %780 = vmatprep.subr.mxu0 %v90_v39  ;;  %v340_v1 = vmax.f32 %v1193_v47, %v1207_v56  ;;  %v1228_v4 = vld [vmem:[#allocation7 + $0x258] sm:$0xff]  ;;  %v1235_v9 = vadd.f32 %v113_v3, %v1225_v2  ;;  %v112_v12 = vld [vmem:[#allocation5 + $0x30] sm:$0xff]  ;;  %v524_v19 = vld [vmem:[#allocation7 + $0x2c8] sm:$0xff] }
  0x4c   :  { %910 = vmatpush3.msra.mxu1 %v1171_v26  ;;  %781 = vmatpush3.msra.mxu0 %v74_v40  ;;  %v1230_v5 = vmax.f32 %v122_v50, %v118_v62  ;;  %v339_v6 = vmax.f32 %v1198_v51, %v1218_v63  ;;  %v525_v14 = vld [vmem:[#allocation7 + $0x2d0] sm:$0xff]  ;;  %v1242_v16 = vadd.f32 %v112_v12, %v1237_v11  ;;  %v523_v22 = vld [vmem:[#allocation7 + $0x2c0] sm:$0xff]  ;;  %v522_v25 = vld [vmem:[#allocation7 + $0x2b8] sm:$0xff] }
  0x4d   :  { %895 = vmatprep.subr.mxu1 %v1180_v33  ;;  %782 = vmatprep.subr.mxu0 %v89_v41  ;;  %v509_v17 = vld [vmem:[#allocation7 + $0x250] sm:$0xff]  ;;  %v127_v18 = vmax.f32 %v1214_v61, %v1235_v9  ;;  %v519_v27 = vld [vmem:[#allocation7 + $0x2a0] sm:$0xff]  ;;  %v502_v28 = vld [vmem:[#allocation7 + $0x218] sm:$0xff] }
  0x4e   :  { %911 = vmatpush3.msra.mxu1 %v1186_v38  ;;  %783 = vmatpush3.msra.mxu0 %v73_v46  ;;  %v126_v21 = vmax.f32 %v1230_v5, %v1242_v16  ;;  %v517_v29 = vld [vmem:[#allocation7 + $0x290] sm:$0xff]  ;;  %v516_v31 = vld [vmem:[#allocation7 + $0x288] sm:$0xff]  ;;  %v499_v34 = vld [vmem:[#allocation7 + $0x200] sm:$0xff] }
  0x4f   :  { %896 = vmatprep.subr.mxu1 %v1191_v45  ;;  %207 = vmatprep.mubr.f32.mxu0 %v1151_v7  ;;  %v508_v7 = vld [vmem:[#allocation7 + $0x248] sm:$0xff]  ;;  %v490_v39 = vld [vmem:[#allocation2 + $0x80] sm:$0xff]  ;;  %v492_v42 = vld [vmem:[#allocation2 + $0x90] sm:$0xff] }
  0x50   :  { %912 = vmatpush3.msra.mxu1 %v1212_v60  ;;  %426 = vmatprep.mubr.f32.mxu1 %v1153_v8  ;;  %v507_v8 = vld [vmem:[#allocation7 + $0x240] sm:$0xff]  ;;  %v491_v35 = vld [vmem:[#allocation2 + $0x88] sm:$0xff]  ;;  %v536_v44 = vld [vmem:[#allocation5 + $0x90] sm:$0xff] }
  0x51   :  { %897 = vmatprep.subr.mxu1 %v1221_v0  ;;  %208 = vmatmul.mubr.f32.vlgmr.msra.gmra.mxu0 %v1167_v23  ;;  %v506_v23 = vld [vmem:[#allocation7 + $0x238] sm:$0xff]  ;;  %v535_v37 = vld [vmem:[#allocation5 + $0x88] sm:$0xff]  ;;  %v534_v43 = vld [vmem:[#allocation5 + $0x80] sm:$0xff]  ;;  %v544_v49 = vadd.f32 %v536_v44, %v492_v42 }
  0x52   :  { %913 = vmatpush3.msra.mxu1 %v1228_v4  ;;  %846 = vmatprep.subr.mxu0 %v1155_v10  ;;  %v505_v10 = vld [vmem:[#allocation7 + $0x230] sm:$0xff]  ;;  %v543_v40 = vadd.f32 %v535_v37, %v491_v35  ;;  %v539_v46 = vld [vmem:[#allocation5 + $0xa8] sm:$0xff]  ;;  %v538_v54 = vld [vmem:[#allocation5 + $0xa0] sm:$0xff] }
  0x53   :  { %898 = vmatprep.subr.mxu1 %v525_v14  ;;  %427 = vmatmul.mubr.f32.gmra.mxu1 %v1158_v13  ;;  %v521_v13 = vld [vmem:[#allocation7 + $0x2b0] sm:$0xff]  ;;  %v541_v57 = vld [vmem:[#allocation5 + $0xb8] sm:$0xff] }
  0x54   :  { %914 = vmatpush3.msra.mxu1 %v509_v17  ;;  %212 = vmatprep.mubr.f32.mxu0 %v1169_v24  ;;  %v520_v24 = vld [vmem:[#allocation7 + $0x2a8] sm:$0xff]  ;;  %v540_v3 = vld [vmem:[#allocation5 + $0xb0] sm:$0xff] }
  0x55   :  { %899 = vmatprep.subr.mxu1 %v524_v19  ;;  %431 = vmatprep.mubr.f32.mxu1 %v1176_v30  ;;  %v501_v30 = vld [vmem:[#allocation7 + $0x210] sm:$0xff] }
  0x56   :  { %915 = vmatpush3.msra.mxu1 %v508_v7  ;;  %847 = vmatpush3.msra.mxu0 %v1160_v15  ;;  %v504_v15 = vld [vmem:[#allocation7 + $0x228] sm:$0xff] }
  0x57   :  { %900 = vmatprep.subr.mxu1 %v523_v22  ;;  %213 = vmatmul.mubr.f32.gmra.mxu0 %v1178_v32  ;;  %v500_v32 = vld [vmem:[#allocation7 + $0x208] sm:$0xff] }
  0x58   :  { %916 = vmatpush3.msra.mxu1 %v507_v8  ;;  %848 = vmatprep.subr.mxu0 %v1164_v20  ;;  %v503_v20 = vld [vmem:[#allocation7 + $0x220] sm:$0xff] }
  0x59   :  { %901 = vmatprep.subr.mxu1 %v522_v25  ;;  %432 = vmatmul.mubr.f32.gmra.mxu1 %v1183_v36  ;;  %v493_v36 = vld [vmem:[#allocation2 + $0x98] sm:$0xff] }
  0x5a   :  { %917 = vmatpush3.msra.mxu1 %v506_v23  ;;  %849 = vmatpush3.msra.mxu0 %v1171_v26  ;;  %v518_v26 = vld [vmem:[#allocation7 + $0x298] sm:$0xff] }
  0x5b   :  { %902 = vmatprep.subr.mxu1 %v521_v13  ;;  %850 = vmatprep.subr.mxu0 %v1180_v33  ;;  %v515_v33 = vld [vmem:[#allocation7 + $0x280] sm:$0xff] }
  0x5c   :  { %918 = vmatpush3.msra.mxu1 %v505_v10  ;;  %217 = vmatprep.mubr.f32.mxu0 %v1195_v48  ;;  %v542_v48 = vadd.f32 %v534_v43, %v490_v39 }
  0x5d   :  { %903 = vmatprep.subr.mxu1 %v520_v24  ;;  %436 = vmatprep.mubr.f32.mxu1 %v1201_v53  ;;  %v494_v53 = vld [vmem:[#allocation2 + $0xa0] sm:$0xff] }
  0x5e   :  { %851 = vmatpush3.msra.mxu0 %v1186_v38  ;;  %919 = vmatpush3.msra.mxu1 %v504_v15  ;;  %v537_v38 = vld [vmem:[#allocation5 + $0x98] sm:$0xff]  ;;  %v550_v59 = vmax.f32 %v542_v48, %v544_v49 }
  0x5f   :  { %218 = vmatmul.mubr.f32.gmra.mxu0 %v1203_v55  ;;  %437 = vmatmul.mubr.f32.gmra.mxu1 %v1209_v58  ;;  %v545_v41 = vadd.f32 %v537_v38, %v493_v36  ;;  %v497_v55 = vld [vmem:[#allocation2 + $0xb8] sm:$0xff]  ;;  %v546_v58 = vadd.f32 %v538_v54, %v494_v53 }
  0x60   :  { %852 = vmatprep.subr.mxu0 %v1191_v45  ;;  %904 = vmatprep.subr.mxu1 %v519_v27  ;;  %v495_v45 = vld [vmem:[#allocation2 + $0xa8] sm:$0xff]  ;;  %v549_v62 = vadd.f32 %v541_v57, %v497_v55 }
  0x61   :  { %853 = vmatpush3.msra.mxu0 %v1212_v60  ;;  %920 = vmatpush3.msra.mxu1 %v503_v20  ;;  %v547_v50 = vadd.f32 %v539_v46, %v495_v45  ;;  %v551_v52 = vmax.f32 %v543_v40, %v545_v41  ;;  %v552_v12 = vmax.f32 %v550_v59, %v546_v58 }
  0x62   :  { %854 = vmatprep.subr.mxu0 %v1221_v0  ;;  %905 = vmatprep.subr.mxu1 %v518_v26 }
  0x63   :  { %222 = vmatprep.mubr.f32.mxu0 %v1225_v2  ;;  %855 = vmatpush3.msra.mxu0 %v1228_v4  ;;  %v553_v0 = vmax.f32 %v551_v52, %v547_v50  ;;  %v496_v2 = vld [vmem:[#allocation2 + $0xb0] sm:$0xff] }
  0x64   :  { %921 = vmatpush3.msra.mxu1 %v502_v28  ;;  %223 = vmatmul.mubr.f32.gmra.mxu0 %v1237_v11  ;;  %v548_v11 = vadd.f32 %v540_v3, %v496_v2 }
  0x65   :  { %856 = vmatprep.subr.mxu0 %v525_v14  ;;  %906 = vmatprep.subr.mxu1 %v517_v29 }
  0x66   :  { %857 = vmatpush3.msra.mxu0 %v509_v17  ;;  %922 = vmatpush3.msra.mxu1 %v501_v30  ;;  %v555_v17 = vmax.f32 %v553_v0, %v549_v62  ;;  %v554_v47 = vmax.f32 %v552_v12, %v548_v11 }
  0x67   :  { %858 = vmatprep.subr.mxu0 %v524_v19  ;;  %907 = vmatprep.subr.mxu1 %v516_v31 }
  0x68   :  { %859 = vmatpush3.msra.mxu0 %v508_v7  ;;  %923 = vmatpush3.msra.mxu1 %v500_v32 }
  0x69   :  { %860 = vmatprep.subr.mxu0 %v523_v22  ;;  %908 = vmatprep.subr.mxu1 %v515_v33 }
  0x6a   :  { %861 = vmatpush3.msra.mxu0 %v507_v8  ;;  %924 = vmatpush3.msra.mxu1 %v499_v34 }
  0x6b   :  { %862 = vmatprep.subr.mxu0 %v522_v25 }
  0x6c   :  { %863 = vmatpush3.msra.mxu0 %v506_v23 }
  0x6d   :  { %864 = vmatprep.subr.mxu0 %v521_v13 }
  0x6e   :  { %865 = vmatpush3.msra.mxu0 %v505_v10 }
  0x6f   :  { %866 = vmatprep.subr.mxu0 %v520_v24  ;;  %v744_v24 = vld [vmem:[%s1400_s4 + $0x1] ss:$0 sm:$0xff] }
  0x70   :  { %867 = vmatpush3.msra.mxu0 %v504_v15 }
  0x71   :  { %868 = vmatprep.subr.mxu0 %v519_v27 }
  0x72   :  { %869 = vmatpush3.msra.mxu0 %v503_v20 }
  0x73   :  { %870 = vmatprep.subr.mxu0 %v518_v26 }
  0x74   :  { %871 = vmatpush3.msra.mxu0 %v502_v28 }
  0x75   :  { %872 = vmatprep.subr.mxu0 %v517_v29  ;;  %v749_v29 = vld [vmem:[%s1400_s4 + $0x2] ss:$0 sm:$0xff] }
  0x76   :  { %873 = vmatpush3.msra.mxu0 %v501_v30 }
  0x77   :  { %874 = vmatprep.subr.mxu0 %v516_v31  ;;  %v739_v31 = vld [vmem:[%s1400_s4] ss:$0 sm:$0xff]  ;;  %s1089_s4 = smov [#allocation8]  }
  0x78   :  { %875 = vmatpush3.msra.mxu0 %v500_v32  ;;  %s712_s24 = sshll.u32 %s1089_s4, 4  ;;  %s713_s24 = int_to_ptr.vmem [resolvable:$true] %s712_s24 }
  0x79   :  { %876 = vmatprep.subr.mxu0 %v515_v33  ;;  %s1033_s27 = scalar_lea.vmem %s713_s24, 1920  ;;  %p1038_p2 = scmp.lt.s32.totalorder %s713_s24, %s713_s24 }
  0x7a   :  { %877 = vmatpush3.msra.mxu0 %v499_v34  ;;  %p1034_p1 = scmp.ne.s32.totalorder %s713_s24, %s1033_s27  ;;  %p1039_p3 = scmp.lt.s32.totalorder %s1033_s27, %s1033_s27 }
  0x7c   :  { %p1040_p4 = por %p1039_p3, %p1038_p2 }
  0x7e   :  { %p1041_p5 = pnand %p1040_p4, %p1034_p1 }
  0xa5   :  { %v347_v60 = vpop.permute.xlu0 %346 }
  0xa6   :  { %vm348_vm3 = vcmp.eq.s32.totalorder %v347_v60, 1  ;;  %v562_v4 = vpop.permute.xlu1 %561 }
  0xa7   :  { %745 = vmatprep.mubr.msk.f32.mxu1 %vm348_vm3, %v340_v1  ;;  %vm563_vm5 = vcmp.eq.s32.totalorder %v562_v4, 1 }
  0xa8   :  { %746 = vmatmul.mubr.msk.f32.gmra.mxu1 %vm348_vm3, %v339_v6 }
  0xa9   :  { %v133_v14 = vpop.permute.xlu0 %132  ;;  %651 = vmatprep.mubr.f32.mxu1 %v497_v55 }
  0xaa   :  { %vm134_vm4 = vcmp.eq.s32.totalorder %v133_v14, 1 }
  0xab   :  { %740 = vmatprep.mubr.msk.f32.mxu0 %vm134_vm4, %v127_v18 }
  0xac   :  { %741 = vmatmul.mubr.msk.f32.gmra.mxu0 %vm134_vm4, %v126_v21  ;;  %652 = vmatmul.mubr.f32.vlgmr.msra.gmra.mxu1 %v496_v2 }
  0xad   :  { %750 = vmatprep.mubr.msk.f32.mxu1 %vm563_vm5, %v555_v17  ;;  %636 = vmatprep.mubr.f32.mxu0 %v491_v35 }
  0xb0   :  { %751 = vmatmul.mubr.msk.f32.gmra.mxu1 %vm563_vm5, %v554_v47  ;;  %637 = vmatmul.mubr.f32.vlgmr.msra.gmra.mxu0 %v490_v39 }
  0xb1   :  { %641 = vmatprep.mubr.f32.mxu0 %v493_v36 }
  0xb4   :  { %642 = vmatmul.mubr.f32.gmra.mxu0 %v492_v42 }
  0xb5   :  { %646 = vmatprep.mubr.f32.mxu0 %v495_v45 }
  0xb8   :  { %647 = vmatmul.mubr.f32.gmra.mxu0 %v494_v53 }
 0x109   :  { %v831_v51 = vpop.f32.mrf.mxu1 }
 0x10b   :  { %v832_v63 = vpop.f32.mrf.mxu1 }
 0x10c   :  { %v833_v58 = vadd.f32 %v832_v63, %v831_v51 }
 0x10e   :  { %v1324_v11 = vadd.f32 %v833_v58, %v744_v24 }
 0x111   :  { %v784_v56 = vpop.f32.mrf.mxu0 }
 0x113   :  { %v834_v1 = vpop.f32.mrf.mxu1  ;;  %v785_v61 = vpop.f32.mrf.mxu0 }
 0x114   :  { %v786_v26 = vadd.f32 %v785_v61, %v784_v56 }
 0x115   :  { %v835_v6 = vpop.f32.mrf.mxu1 }
 0x116   :  { %v1302_v39 = vadd.f32 %v786_v26, %v739_v31  ;;  %v836_v49 = vadd.f32 %v835_v6, %v834_v1  ;;  %v447_v6 = vmul.f32 %v1324_v11, %v1324_v11 }
 0x117   :  { %v787_v9 = vpop.f32.mrf.mxu0 }
 0x118   :  { %v233_v50 = vmul.f32 %v1302_v39, %v1302_v39  ;;  %v1316_v59 = vadd.f32 %v836_v49, %v744_v24 }
 0x119   :  { %v837_v18 = vpop.f32.mrf.mxu1  ;;  %v788_v5 = vpop.f32.mrf.mxu0 }
 0x11a   :  { %v789_v42 = vadd.f32 %v788_v5, %v787_v9  ;;  %v448_v51 = vmul.f32 %v1316_v59, %v1316_v59 }
 0x11b   :  { %v838_v16 = vpop.f32.mrf.mxu1 }
 0x11c   :  { %v1310_v53 = vadd.f32 %v789_v42, %v739_v31  ;;  %v839_v14 = vadd.f32 %v838_v16, %v837_v18 }
 0x11e   :  { %v234_v2 = vmul.f32 %v1310_v53, %v1310_v53  ;;  %v1334_v61 = vadd.f32 %v839_v14, %v744_v24 }
 0x11f   :  { %v790_v19 = vpop.f32.mrf.mxu0  ;;  %v840_v21 = vpop.f32.mrf.mxu1 }
 0x121   :  { %v791_v7 = vpop.f32.mrf.mxu0  ;;  %v841_v22 = vpop.f32.mrf.mxu1 }
 0x122   :  { %v792_v43 = vadd.f32 %v791_v7, %v790_v19  ;;  %v842_v62 = vadd.f32 %v841_v22, %v840_v21  ;;  %v449_v19 = vmul.f32 %v1334_v61, %v1334_v61 }
 0x124   :  { %v793_v8 = vpop.f32.mrf.mxu0  ;;  %v1312_v54 = vadd.f32 %v792_v43, %v739_v31  ;;  %v1326_v17 = vadd.f32 %v842_v62, %v744_v24 }
 0x126   :  { %v794_v23 = vpop.f32.mrf.mxu0  ;;  %v235_v3 = vmul.f32 %v1312_v54, %v1312_v54  ;;  %v450_v9 = vmul.f32 %v1326_v17, %v1326_v17 }
 0x127   :  { %v795_v55 = vadd.f32 %v794_v23, %v793_v8 }
 0x129   :  { %v1318_v0 = vadd.f32 %v795_v55, %v739_v31 }
 0x12b   :  { %v236_v47 = vmul.f32 %v1318_v0, %v1318_v0 }
 0x168   :  { %v843_v25 = vpop.f32.mrf.mxu1 }
 0x16a   :  { %v844_v13 = vpop.f32.mrf.mxu1 }
 0x16b   :  { %v845_v10 = vadd.f32 %v844_v13, %v843_v25 }
 0x16c   :  { %v796_v15 = vpop.f32.mrf.mxu0  ;;  %v887_v27 = vpop.f32.mrf.mxu1 }
 0x16d   :  { %v1288_v20 = vadd.f32 %v845_v10, %v744_v24 }
 0x16e   :  { %v797_v28 = vpop.f32.mrf.mxu0  ;;  %v888_v30 = vpop.f32.mrf.mxu1 }
 0x16f   :  { %v798_v32 = vadd.f32 %v797_v28, %v796_v15  ;;  %v889_v33 = vadd.f32 %v888_v30, %v887_v27  ;;  %v451_v34 = vmul.f32 %v1288_v20, %v1288_v20 }
 0x170   :  { %v890_v35 = vpop.f32.mrf.mxu1  ;;  %v878_v36 = vpop.f32.mrf.mxu0 }
 0x171   :  { %v1298_v37 = vadd.f32 %v798_v32, %v739_v31  ;;  %v1300_v38 = vadd.f32 %v889_v33, %v749_v29  ;;  %460 = vadd.xlane.f32.xlu0 %v451_v34 }
 0x172   :  { %v891_v40 = vpop.f32.mrf.mxu1  ;;  %v879_v41 = vpop.f32.mrf.mxu0 }
 0x173   :  { %v892_v44 = vadd.f32 %v891_v40, %v890_v35  ;;  %v237_v45 = vmul.f32 %v1298_v37, %v1298_v37  ;;  %v880_v4 = vadd.f32 %v879_v41, %v878_v36 }
 0x174   :  { %v881_v46 = vpop.f32.mrf.mxu0 }
 0x175   :  { %v1306_v48 = vadd.f32 %v892_v44, %v749_v29  ;;  %246 = vadd.xlane.f32.xlu1 %v237_v45  ;;  %v1332_v56 = vadd.f32 %v880_v4, %v749_v29 }
 0x176   :  { %v882_v52 = vpop.f32.mrf.mxu0 }
 0x177   :  { %v666_v57 = vmul.f32 %v1306_v48, %v1306_v48  ;;  %v883_v63 = vadd.f32 %v882_v52, %v881_v46  ;;  %v662_v16 = vmul.f32 %v1332_v56, %v1332_v56 }
 0x178   :  { %v884_v60 = vpop.f32.mrf.mxu0 }
 0x179   :  { %675 = vadd.xlane.f32.xlu0 %v666_v57  ;;  %238 = vadd.xlane.f32.xlu1 %v233_v50  ;;  %v1340_v18 = vadd.f32 %v883_v63, %v749_v29 }
 0x17a   :  { %v885_v12 = vpop.f32.mrf.mxu0 }
 0x17b   :  { %v886_v1 = vadd.f32 %v885_v12, %v884_v60  ;;  %v663_v21 = vmul.f32 %v1340_v18, %v1340_v18 }
 0x17d   :  { %240 = vadd.xlane.f32.xlu0 %v234_v2  ;;  %242 = vadd.xlane.f32.xlu1 %v235_v3  ;;  %v1342_v5 = vadd.f32 %v886_v1, %v749_v29 }
 0x17f   :  { %v664_v7 = vmul.f32 %v1342_v5, %v1342_v5 }
 0x181   :  { %244 = vadd.xlane.f32.xlu0 %v236_v47  ;;  %454 = vadd.xlane.f32.xlu1 %v448_v51 }
 0x185   :  { %452 = vadd.xlane.f32.xlu0 %v447_v6  ;;  %458 = vadd.xlane.f32.xlu1 %v450_v9 }
 0x189   :  { %456 = vadd.xlane.f32.xlu0 %v449_v19  ;;  %667 = vadd.xlane.f32.xlu1 %v662_v16 }
 0x18d   :  { %669 = vadd.xlane.f32.xlu0 %v663_v21  ;;  %671 = vadd.xlane.f32.xlu1 %v664_v7 }
 0x1fa   :  { %v461_v22 = vpop.xlane.xlu0 %460 }
 0x1fb   :  { %v466_v8 = vmax.f32 %v461_v22, 1e-24 }
 0x1fd   :  { %937 = vrsqrt.f32 %v466_v8 }
 0x1fe   :  { %v247_v25 = vpop.xlane.xlu1 %246 }
 0x1ff   :  { %v252_v23 = vmax.f32 %v247_v25, 1e-24 }
 0x201   :  { %939 = vrsqrt.f32 %v252_v23 }
 0x202   :  { %v676_v13 = vpop.xlane.xlu0 %675  ;;  %v239_v10 = vpop.xlane.xlu1 %238 }
 0x203   :  { %v681_v24 = vmax.f32 %v676_v13, 1e-24  ;;  %v248_v15 = vmax.f32 %v239_v10, 1e-24 }
 0x205   :  { %941 = vrsqrt.f32 %v681_v24 }
 0x206   :  { %943 = vrsqrt.f32 %v248_v15  ;;  %v241_v27 = vpop.xlane.xlu0 %240  ;;  %v243_v26 = vpop.xlane.xlu1 %242 }
 0x207   :  { %v249_v28 = vmax.f32 %v241_v27, 1e-24  ;;  %v250_v29 = vmax.f32 %v243_v26, 1e-24 }
 0x209   :  { %945 = vrsqrt.f32 %v249_v28 }
 0x20a   :  { %v938_v30 = vpop.eup %937  ;;  %947 = vrsqrt.f32 %v250_v29  ;;  %v245_v31 = vpop.xlane.xlu0 %244 }
 0x20b   :  { %v455_v32 = vpop.xlane.xlu1 %454  ;;  %v251_v33 = vmax.f32 %v245_v31, 1e-24  ;;  %v1353_v35 = vmul.f32 %v938_v30, %v1288_v20  ;;  %v665_v20 = vmul.f32 %v1300_v38, %v1300_v38 }
 0x20c   :  { %v463_v34 = vmax.f32 %v455_v32, 1e-24 }
 0x20d   :  { %949 = vrsqrt.f32 %v251_v33  ;;  %482 = vst [vmem:[#allocation8 + $0x48] sm:$0xff] %v1353_v35  ;;  %v483_v36 = vmul.f32 %v1353_v35, %v1353_v35 }
 0x20e   :  { %v940_v40 = vpop.eup %939  ;;  %951 = vrsqrt.f32 %v463_v34  ;;  %v453_v41 = vpop.xlane.xlu0 %452 }
 0x20f   :  { %v459_v42 = vpop.xlane.xlu1 %458  ;;  %v462_v43 = vmax.f32 %v453_v41, 1e-24  ;;  %484 = vadd.xlane.f32.xlu0 %v483_v36  ;;  %v1359_v45 = vmul.f32 %v940_v40, %v1298_v37 }
 0x210   :  { %v465_v44 = vmax.f32 %v459_v42, 1e-24 }
 0x211   :  { %953 = vrsqrt.f32 %v462_v43  ;;  %v268_v46 = vmul.f32 %v1359_v45, %v1359_v45  ;;  %267 = vst [vmem:[#allocation8 + $0x20] sm:$0xff] %v1359_v45 }
 0x212   :  { %v942_v49 = vpop.eup %941  ;;  %955 = vrsqrt.f32 %v465_v44  ;;  %v457_v50 = vpop.xlane.xlu0 %456 }
 0x213   :  { %v668_v52 = vpop.xlane.xlu1 %667  ;;  %v944_v55 = vpop.eup %943  ;;  %v464_v57 = vmax.f32 %v457_v50, 1e-24  ;;  %673 = vadd.xlane.f32.xlu0 %v665_v20  ;;  %269 = vadd.xlane.f32.xlu1 %v268_v46  ;;  %v1367_v37 = vmul.f32 %v942_v49, %v1306_v48 }
 0x214   :  { %v677_v58 = vmax.f32 %v668_v52, 1e-24  ;;  %v258_v60 = vmul.f32 %v944_v55, %v1302_v39 }
 0x215   :  { %957 = vrsqrt.f32 %v464_v57  ;;  %697 = vst [vmem:[#allocation8 + $0x70] sm:$0xff] %v1367_v37  ;;  %v698_v62 = vmul.f32 %v1367_v37, %v1367_v37 }
 0x216   :  { %v946_v2 = vpop.eup %945  ;;  %263 = vst [vmem:[#allocation8] sm:$0xff] %v258_v60  ;;  %959 = vrsqrt.f32 %v677_v58  ;;  %v670_v3 = vpop.xlane.xlu0 %669 }
 0x217   :  { %v672_v4 = vpop.xlane.xlu1 %671  ;;  %v948_v12 = vpop.eup %947  ;;  %v259_v14 = vmul.f32 %v946_v2, %v1310_v53  ;;  %v678_v47 = vmax.f32 %v670_v3, 1e-24  ;;  %699 = vadd.xlane.f32.xlu1 %v698_v62 }
 0x218   :  { %v679_v51 = vmax.f32 %v672_v4, 1e-24  ;;  %v260_v48 = vmul.f32 %v948_v12, %v1312_v54 }
 0x219   :  { %264 = vst [vmem:[#allocation8 + $0x8] sm:$0xff] %v259_v14  ;;  %961 = vrsqrt.f32 %v678_v47 }
 0x21a   :  { %v950_v39 = vpop.eup %949  ;;  %265 = vst [vmem:[#allocation8 + $0x10] sm:$0xff] %v260_v48  ;;  %963 = vrsqrt.f32 %v679_v51 }
 0x21b   :  { %v952_v63 = vpop.eup %951  ;;  %v261_v1 = vmul.f32 %v950_v39, %v1318_v0 }
 0x21c   :  { %v473_v6 = vmul.f32 %v952_v63, %v1316_v59 }
 0x21d   :  { %266 = vst [vmem:[#allocation8 + $0x18] sm:$0xff] %v261_v1 }
 0x21e   :  { %v954_v9 = vpop.eup %953  ;;  %479 = vst [vmem:[#allocation8 + $0x30] sm:$0xff] %v473_v6 }
 0x21f   :  { %v956_v16 = vpop.eup %955  ;;  %v472_v53 = vmul.f32 %v954_v9, %v1324_v11 }
 0x220   :  { %v475_v19 = vmul.f32 %v956_v16, %v1326_v17 }
 0x221   :  { %478 = vst [vmem:[#allocation8 + $0x28] sm:$0xff] %v472_v53 }
 0x222   :  { %v958_v54 = vpop.eup %957  ;;  %481 = vst [vmem:[#allocation8 + $0x40] sm:$0xff] %v475_v19 }
 0x223   :  { %v960_v21 = vpop.eup %959  ;;  %v474_v7 = vmul.f32 %v958_v54, %v1334_v61 }
 0x224   :  { %v687_v22 = vmul.f32 %v960_v21, %v1332_v56 }
 0x225   :  { %480 = vst [vmem:[#allocation8 + $0x38] sm:$0xff] %v474_v7 }
 0x226   :  { %v962_v0 = vpop.eup %961  ;;  %693 = vst [vmem:[#allocation8 + $0x50] sm:$0xff] %v687_v22 }
 0x227   :  { %v964_v59 = vpop.eup %963  ;;  %v688_v8 = vmul.f32 %v962_v0, %v1340_v18 }
 0x228   :  { %v689_v25 = vmul.f32 %v964_v59, %v1342_v5 }
 0x229   :  { %694 = vst [vmem:[#allocation8 + $0x58] sm:$0xff] %v688_v8 }
 0x22a   :  { %695 = vst [vmem:[#allocation8 + $0x60] sm:$0xff] %v689_v25 }
 0x298   :  { %v485_v11 = vpop.xlane.xlu0 %484 }
 0x299   :  { %v486_v17 = vmax.f32 %v485_v11, 1e-24 }
 0x29b   :  { %965 = vrsqrt.f32 %v486_v17 }
 0x29c   :  { %v674_v23 = vpop.xlane.xlu0 %673  ;;  %v270_v13 = vpop.xlane.xlu1 %269 }
 0x29d   :  { %v680_v10 = vmax.f32 %v674_v23, 1e-24  ;;  %v271_v24 = vmax.f32 %v270_v13, 1e-24 }
 0x29f   :  { %967 = vrsqrt.f32 %v680_v10 }
 0x2a0   :  { %969 = vrsqrt.f32 %v271_v24  ;;  %v700_v56 = vpop.xlane.xlu1 %699 }
 0x2a1   :  { %v701_v61 = vmax.f32 %v700_v56, 1e-24 }
 0x2a3   :  { %971 = vrsqrt.f32 %v701_v61 }
 0x2a8   :  { %v966_v15 = vpop.eup %965 }
 0x2a9   :  { %v488_v27 = vmul.f32 %v966_v15, %v1353_v35 }
 0x2ab   :  { %705 = vst [vmem:[#allocation9 + $0x8] sm:$0xff] %v488_v27 }
 0x2ac   :  { %v968_v18 = vpop.eup %967 }
 0x2ad   :  { %v970_v5 = vpop.eup %969  ;;  %v690_v26 = vmul.f32 %v968_v18, %v1300_v38 }
 0x2ae   :  { %v273_v28 = vmul.f32 %v970_v5, %v1359_v45 }
 0x2af   :  { %696 = vst [vmem:[#allocation8 + $0x68] sm:$0xff] %v690_v26 }
 0x2b0   :  { %v972_v29 = vpop.eup %971 }
 0x2b1   :  { %1044 = shalt.err (!%p1041_p5)
}
 0x2b2   :  { %718 = dma.vmem_to_hbm [thread:$0]  %s713_s24, 1920, %s1401_s5, [#allocation4], %s1086_s1, %s1086_s1, %s1087_s12   ;;  %704 = vst [vmem:[#allocation9] sm:$0xff] %v273_v28  ;;  %v703_v38 = vmul.f32 %v972_v29, %v1367_v37 }
 0x2b3   :  { %s1053_s30 = scalar_lea.vmem %s726_s26, 384  ;;  %p1058_p7 = scmp.lt.s32.totalorder %s726_s26, %s726_s26 }
 0x2b4   :  { %706 = vst [vmem:[#allocation9 + $0x10] sm:$0xff] %v703_v38  ;;  %p1054_p6 = scmp.ne.s32.totalorder %s726_s26, %s1053_s30  ;;  %p1059_p8 = scmp.lt.s32.totalorder %s1053_s30, %s1053_s30 }
 0x2b6   :  { %p1060_p9 = por %p1059_p8, %p1058_p7 }
 0x2b8   :  { %p1061_p10 = pnand %p1060_p9, %p1054_p6 }
 0x2ba   :  { %1064 = shalt.err (!%p1061_p10)
}
 0x2bb   :  { %728 = dma.vmem_to_hbm [thread:$0]  %s726_s26, 384, %s1402_s6, [#allocation10]  }
 0x2bc   :  { %1077 = dma.done.wait [#allocation4], 1920  }
 0x2bd   :  { %1078 = vsyncadd [#allocation4], 4294965376 }
 0x2be   :  { %1079 = dma.done.wait [#allocation10], 384  }
 0x2bf   :  { %1080 = vsyncadd [#allocation10], 4294966912 }
 0x2c0   :  { %735 = vsyncpa [#allocation3], 1 }
 0x2c1   :  { %736 = vsyncpa [#allocation6], 1 }
 0x2c2   :  { %737 = vsyncpa [#allocation4], 1 }
 0x2c3   :  { %738 = vsyncpa [#allocation10], 1 }

</bundles_post_ra>
